<compile_context>
chip_gen: v7x
topology: tpu7x:2x2x1
jax: 0.10.0
libtpu: 0.0.40
codegen_flags: <defaults>
</compile_context>

<pallas_src>
import math

import jax
import jax.numpy as jnp
from jax.experimental import pallas as pl
from jax.experimental.pallas import tpu as pltpu

_LANES = 128
_SUBLANES = 8
_EPS = 1e-12  # matches torch.nn.functional.normalize default eps


def _make_soft_att_loss_kernel(seq_len: int):
    inv_s = 1.0 / float(seq_len)

    def kernel(p_ref, t_ref, o_ref):
        # (Bt*S, D) slab; cast native dtype -> f32 in VMEM (no extra HBM pass).
        x = p_ref[...].astype(jnp.float32)
        y = t_ref[...].astype(jnp.float32)

        # Dot-product identity for || x/max(||x||,eps) - y/max(||y||,eps) ||_2.
        sxx = jnp.sum(x * x, axis=-1, keepdims=True)  # (rows, 1)
        syy = jnp.sum(y * y, axis=-1, keepdims=True)  # (rows, 1)
        sxy = jnp.sum(x * y, axis=-1, keepdims=True)  # (rows, 1)

        mx = jnp.maximum(jnp.sqrt(sxx), _EPS)
        my = jnp.maximum(jnp.sqrt(syy), _EPS)

        sq = sxx / (mx * mx) + syy / (my * my) - 2.0 * (sxy / (mx * my))
        row_norm = jnp.sqrt(jnp.maximum(sq, 0.0))      # (rows, 1)

        # sum(row_norm) / S == sum of the Bt per-batch means in this block.
        partial = jnp.sum(row_norm, keepdims=True) * jnp.float32(inv_s)  # (1, 1)

        # Lane-dense (8, 128) broadcast store; final reduction happens outside.
        o_ref[...] = jnp.broadcast_to(partial, o_ref.shape).astype(o_ref.dtype)

    return kernel


def _choose_batch_tile(B, S, D, itemsize, vmem_budget_bytes=8 * 1024 * 1024):
    """Largest divisor of B whose (Bt*S, D) block (2 inputs x 2 buffers) fits."""
    per_elem = max(1, S * D * itemsize)
    max_bt = max(1, vmem_budget_bytes // (4 * per_elem))
    fitting = [c for c in range(1, B + 1) if B % c == 0 and c <= max_bt]
    if not fitting:
        return 1
    # Prefer sublane-aligned (Bt*S % 8 == 0) or full-batch blocks.
    aligned = [c for c in fitting if (c * S) % _SUBLANES == 0 or c == B]
    return max(aligned) if aligned else max(fitting)


def soft_att_loss(pred_heatmaps, target_heatmaps, size_average: bool = True):
    """Pallas implementation of SoftAttLoss.forward."""
    assert pred_heatmaps.shape == target_heatmaps.shape
    B = pred_heatmaps.shape[0]
    S = pred_heatmaps.shape[1]
    D = int(math.prod(pred_heatmaps.shape[2:]))

    # No dtype cast here: keep the native dtype on the HBM side.
    p = jnp.reshape(pred_heatmaps, (B * S, D))
    t = jnp.reshape(target_heatmaps, (B * S, D))

    bt = _choose_batch_tile(B, S, D, jnp.dtype(p.dtype).itemsize)
    num_blocks = B // bt
    rows = bt * S

    out = pl.pallas_call(
        _make_soft_att_loss_kernel(S),
        out_shape=jax.ShapeDtypeStruct((num_blocks * _SUBLANES, _LANES), jnp.float32),
        grid_spec=pltpu.PrefetchScalarGridSpec(
            num_scalar_prefetch=0,
            grid=(num_blocks,),
            in_specs=[
                pl.BlockSpec((rows, D), lambda i: (i, 0)),
                pl.BlockSpec((rows, D), lambda i: (i, 0)),
            ],
            out_specs=pl.BlockSpec((_SUBLANES, _LANES), lambda i: (i, 0)),
        ),
        compiler_params=pltpu.CompilerParams(
            dimension_semantics=("parallel",),  # independent blocks -> megacore-shardable
        ),
    )(p, t)

    # One representative scalar per block (all 8x128 entries are identical).
    partials = out[::_SUBLANES, 0]          # (num_blocks,) sums of per-batch means
    total = jnp.sum(partials)
    if size_average:
        total = total / jnp.float32(B)
    return total


def _reference_soft_att_loss(pred, target, size_average=True):
    B, S = pred.shape[0], pred.shape[1]
    p = jnp.reshape(pred, (B, S, -1)).astype(jnp.float32)
    t = jnp.reshape(target, (B, S, -1)).astype(jnp.float32)
    eps = 1e-12
    p = p / jnp.maximum(jnp.linalg.norm(p, axis=2, keepdims=True), eps)
    t = t / jnp.maximum(jnp.linalg.norm(t, axis=2, keepdims=True), eps)
    l = jnp.linalg.norm(p - t, axis=2)
    l = jnp.mean(l, axis=1)
    return jnp.mean(l) if size_average else jnp.sum(l)


if __name__ == "__main__":
    # Small shapes implied by the forward: (batch, seq_len, H, W)
    B, S, H, W = 2, 8, 16, 16
    key = jax.random.PRNGKey(0)
    k1, k2 = jax.random.split(key)
    pred = jax.random.normal(k1, (B, S, H, W), dtype=jnp.float32)
    target = jax.random.normal(k2, (B, S, H, W), dtype=jnp.float32)

    # f32 inputs, size_average=True
    loss = soft_att_loss(pred, target, size_average=True)
    jax.block_until_ready(loss)
    ref = _reference_soft_att_loss(pred, target, size_average=True)
    assert jnp.allclose(loss, ref, rtol=1e-5, atol=1e-6), (loss, ref)

    # Native bf16 inputs (no wrapper up-cast), size_average=False
    pred_bf = pred.astype(jnp.bfloat16)
    target_bf = target.astype(jnp.bfloat16)
    loss_bf = soft_att_loss(pred_bf, target_bf, size_average=False)
    jax.block_until_ready(loss_bf)
    ref_bf = _reference_soft_att_loss(pred_bf, target_bf, size_average=False)
    assert jnp.allclose(loss_bf, ref_bf, rtol=1e-4, atol=1e-5), (loss_bf, ref_bf)

    print("KERNEL_OK")
</pallas_src>

<mosaic_0001>
module attributes {stable_mosaic.version = 11 : i64} {
  func.func @kernel(%arg0: i32, %arg1: memref<16x256xf32, #tpu.memory_space<vmem>>, %arg2: memref<16x256xf32, #tpu.memory_space<vmem>>, %arg3: memref<8x128xf32, #tpu.memory_space<vmem>>) attributes {dimension_semantics = [#tpu.dimension_semantics<parallel>], iteration_bounds = array<i64: 1>, scalar_prefetch = 0 : i64, scratch_operands = 0 : i64, tpu.core_type = #tpu.core_type<tc>, window_params = [{transform_indices = @transform_0, window_bounds = array<i64: 16, 256>}, {transform_indices = @transform_1, window_bounds = array<i64: 16, 256>}, {transform_indices = @transform_2, window_bounds = array<i64: 8, 128>}]} {
    %c0 = arith.constant 0 : index
    %c0_0 = arith.constant 0 : index
    %0 = vector.load %arg1[%c0, %c0_0] : memref<16x256xf32, #tpu.memory_space<vmem>>, vector<16x256xf32>
    %c0_1 = arith.constant 0 : index
    %c0_2 = arith.constant 0 : index
    %1 = vector.load %arg2[%c0_1, %c0_2] : memref<16x256xf32, #tpu.memory_space<vmem>>, vector<16x256xf32>
    %2 = arith.mulf %0, %0 : vector<16x256xf32>
    %cst = arith.constant dense<0.000000e+00> : vector<16xf32>
    %3 = vector.multi_reduction <add>, %2, %cst [1] : vector<16x256xf32> to vector<16xf32>
    %4 = vector.shape_cast %3 : vector<16xf32> to vector<16x1xf32>
    %5 = arith.mulf %1, %1 : vector<16x256xf32>
    %cst_3 = arith.constant dense<0.000000e+00> : vector<16xf32>
    %6 = vector.multi_reduction <add>, %5, %cst_3 [1] : vector<16x256xf32> to vector<16xf32>
    %7 = vector.shape_cast %6 : vector<16xf32> to vector<16x1xf32>
    %8 = arith.mulf %0, %1 : vector<16x256xf32>
    %cst_4 = arith.constant dense<0.000000e+00> : vector<16xf32>
    %9 = vector.multi_reduction <add>, %8, %cst_4 [1] : vector<16x256xf32> to vector<16xf32>
    %10 = vector.shape_cast %9 : vector<16xf32> to vector<16x1xf32>
    %11 = math.sqrt %4 : vector<16x1xf32>
    %cst_5 = arith.constant 9.99999996E-13 : f32
    %12 = vector.broadcast %cst_5 : f32 to vector<16x1xf32>
    %13 = arith.maximumf %11, %12 : vector<16x1xf32>
    %14 = math.sqrt %7 : vector<16x1xf32>
    %cst_6 = arith.constant 9.99999996E-13 : f32
    %15 = vector.broadcast %cst_6 : f32 to vector<16x1xf32>
    %16 = arith.maximumf %14, %15 : vector<16x1xf32>
    %17 = arith.mulf %13, %13 : vector<16x1xf32>
    %18 = arith.divf %4, %17 : vector<16x1xf32>
    %19 = arith.mulf %16, %16 : vector<16x1xf32>
    %20 = arith.divf %7, %19 : vector<16x1xf32>
    %21 = arith.addf %18, %20 : vector<16x1xf32>
    %22 = arith.mulf %13, %16 : vector<16x1xf32>
    %23 = arith.divf %10, %22 : vector<16x1xf32>
    %cst_7 = arith.constant 2.000000e+00 : f32
    %24 = vector.broadcast %cst_7 : f32 to vector<16x1xf32>
    %25 = arith.mulf %24, %23 : vector<16x1xf32>
    %26 = arith.subf %21, %25 : vector<16x1xf32>
    %cst_8 = arith.constant 0.000000e+00 : f32
    %27 = vector.broadcast %cst_8 : f32 to vector<16x1xf32>
    %28 = arith.maximumf %26, %27 : vector<16x1xf32>
    %29 = math.sqrt %28 : vector<16x1xf32>
    %30 = vector.shape_cast %29 : vector<16x1xf32> to vector<1x16x1xf32>
    %cst_9 = arith.constant dense<0.000000e+00> : vector<1xf32>
    %31 = vector.multi_reduction <add>, %30, %cst_9 [1, 2] : vector<1x16x1xf32> to vector<1xf32>
    %32 = vector.shape_cast %31 : vector<1xf32> to vector<1x1x1xf32>
    %33 = vector.extract %32[0, 0, 0] : f32 from vector<1x1x1xf32>
    %34 = vector.broadcast %33 : f32 to vector<1x1xf32>
    %cst_10 = arith.constant 1.250000e-01 : f32
    %35 = vector.broadcast %cst_10 : f32 to vector<1x1xf32>
    %36 = arith.mulf %34, %35 : vector<1x1xf32>
    %37 = vector.shape_cast %36 : vector<1x1xf32> to vector<1x1xf32>
    %38 = vector.broadcast %37 : vector<1x1xf32> to vector<8x128xf32>
    %c0_11 = arith.constant 0 : index
    %c0_12 = arith.constant 0 : index
    %39 = vector.load %arg3[%c0_11, %c0_12] : memref<8x128xf32, #tpu.memory_space<vmem>>, vector<8x128xf32>
    tpu.vector_store %arg3[%c0_11, %c0_12], %38 {strides = array<i32>} : memref<8x128xf32, #tpu.memory_space<vmem>>, vector<8x128xf32>,
    return
  }
  func.func @transform_0(%arg0: i32) -> (i32, i32) {
    %c0_i32 = arith.constant 0 : i32
    %c0_i32_0 = arith.constant 0 : i32
    return %arg0, %c0_i32 : i32, i32
  }
  func.func @transform_1(%arg0: i32) -> (i32, i32) {
    %c0_i32 = arith.constant 0 : i32
    %c0_i32_0 = arith.constant 0 : i32
    return %arg0, %c0_i32 : i32, i32
  }
  func.func @transform_2(%arg0: i32) -> (i32, i32) {
    %c0_i32 = arith.constant 0 : i32
    %c0_i32_0 = arith.constant 0 : i32
    return %arg0, %c0_i32 : i32, i32
  }
}

</mosaic_0001>

<bundles_post_ra>
// kernel: tpu_custom_call.1
= control target key start
LH: loop header
LB: loop body
LE: loop exit
PB: predicated region body
PF: predicated region fallthrough
CT: control target
= control target key end

     0   :  { %7 = vsyncpa [#allocation3], 0  ;;  %s341_s0 = inlined_call_operand.hbm [shape: f32[16,256], index: 0, kind: input, shape index: {}]   ;;  %s342_s1 = inlined_call_operand.hbm [shape: f32[16,256], index: 1, kind: input, shape index: {}]   ;;  %s343_s2 = inlined_call_operand.hbm [shape: f32[8,128], index: 2, kind: output, shape index: {}]  }
   0x1   :  { %8 = vsyncpa [#allocation6], 0 }
   0x2   :  { %9 = vsyncpa [#allocation4], 0  ;;  %s285_s9 = smov [#allocation2]   ;;  %s213_s13 = scalar_lea.hbm %s341_s0, 512 }
   0x3   :  { %s15_s10 = sshll.u32 %s285_s9, 4  ;;  %p214_p0 = scmp.ne.s32.totalorder %s341_s0, %s213_s13  ;;  %s16_s10 = int_to_ptr.vmem [resolvable:$true] %s15_s10 }
   0x4   :  { %p217_p1 = scmp.lt.u32.totalorder %s213_s13, %s341_s0 }
   0x6   :  { %p219_p2 = pnand %p217_p1, %p214_p0 }
   0x8   :  { %222 = shalt.err (!%p219_p2)
}
   0x9   :  { %s223_s18 = scalar_lea.vmem %s16_s10, 512  ;;  %p228_p4 = scmp.lt.s32.totalorder %s16_s10, %s16_s10 }
   0xa   :  { %p224_p3 = scmp.ne.s32.totalorder %s16_s10, %s223_s18  ;;  %p229_p5 = scmp.lt.s32.totalorder %s223_s18, %s223_s18 }
   0xc   :  { %p230_p6 = por %p229_p5, %p228_p4 }
   0xe   :  { %p231_p7 = pnand %p230_p6, %p224_p3 }
  0x10   :  { %234 = shalt.err (!%p231_p7)
}
  0x11   :  { %s286_s19 = smov 256   ;;  %s287_s20 = smov 16  }
  0x12   :  { %21 = dma.hbm_to_vmem [thread:$0]  %s341_s0, 512, %s16_s10, [#allocation3], %s286_s19, %s286_s19, %s287_s20  }
  0x13   :  { %s288_s23 = smov [#allocation5]   ;;  %s235_s27 = scalar_lea.hbm %s342_s1, 512 }
  0x14   :  { %s27_s24 = sshll.u32 %s288_s23, 4  ;;  %p236_p8 = scmp.ne.s32.totalorder %s342_s1, %s235_s27  ;;  %s28_s24 = int_to_ptr.vmem [resolvable:$true] %s27_s24 }
  0x15   :  { %p239_p9 = scmp.lt.u32.totalorder %s235_s27, %s342_s1 }
  0x17   :  { %p241_p10 = pnand %p239_p9, %p236_p8 }
  0x19   :  { %244 = shalt.err (!%p241_p10)
}
  0x1a   :  { %s245_s4 = scalar_lea.vmem %s28_s24, 512  ;;  %p250_p12 = scmp.lt.s32.totalorder %s28_s24, %s28_s24 }
  0x1b   :  { %p246_p11 = scmp.ne.s32.totalorder %s28_s24, %s245_s4  ;;  %p251_p13 = scmp.lt.s32.totalorder %s245_s4, %s245_s4 }
  0x1d   :  { %p252_p0 = por %p251_p13, %p250_p12 }
  0x1f   :  { %p253_p1 = pnand %p252_p0, %p246_p11 }
  0x21   :  { %256 = shalt.err (!%p253_p1)
}
  0x22   :  { %33 = dma.hbm_to_vmem [thread:$0]  %s342_s1, 512, %s28_s24, [#allocation6], %s286_s19, %s286_s19, %s287_s20  }
  0x23   :  { %279 = dma.done.wait [#allocation3], 512  }
  0x24   :  { %280 = vsyncadd [#allocation3], 4294966784 }
  0x25   :  { %281 = dma.done.wait [#allocation6], 512  }
  0x26   :  { %282 = vsyncadd [#allocation6], 4294966784  ;;  %v44_v0 = vld [vmem:[#allocation5] sm:$0xff]  ;;  %v45_v1 = vld [vmem:[#allocation5 + $0x8] sm:$0xff]  ;;  %vm150_vm11 = vcmask 7168   ;;  %s289_s1 = smov [#allocation7]  }
  0x27   :  { %v40_v2 = vld [vmem:[#allocation2] sm:$0xff]  ;;  %v58_v3 = vmul.f32 %v44_v0, %v44_v0  ;;  %v59_v4 = vmul.f32 %v45_v1, %v45_v1  ;;  %v41_v5 = vld [vmem:[#allocation2 + $0x8] sm:$0xff]  ;;  %v46_v7 = vld [vmem:[#allocation5 + $0x10] sm:$0xff]  ;;  %s172_s6 = sshll.u32 %s289_s1, 4  ;;  %s173_s6 = int_to_ptr.vmem [resolvable:$true] %s172_s6 }
  0x28   :  { %v48_v6 = vmul.f32 %v40_v2, %v40_v2  ;;  %v47_v8 = vld [vmem:[#allocation5 + $0x18] sm:$0xff]  ;;  %v49_v9 = vmul.f32 %v41_v5, %v41_v5  ;;  %v60_v10 = vmul.f32 %v46_v7, %v46_v7  ;;  %v42_v12 = vld [vmem:[#allocation2 + $0x10] sm:$0xff]  ;;  %v68_v22 = vmul.f32 %v44_v0, %v40_v2  ;;  %s257_s8 = scalar_lea.vmem %s173_s6, 128  ;;  %p262_p3 = scmp.lt.s32.totalorder %s173_s6, %s173_s6 }
  0x29   :  { %v61_v11 = vmul.f32 %v47_v8, %v47_v8  ;;  %v43_v13 = vld [vmem:[#allocation2 + $0x18] sm:$0xff]  ;;  %v62_v14 = vadd.f32 %v59_v4, %v58_v3  ;;  %v50_v15 = vmul.f32 %v42_v12, %v42_v12  ;;  %v70_v19 = vmul.f32 %v46_v7, %v42_v12  ;;  %p258_p2 = scmp.ne.s32.totalorder %s173_s6, %s257_s8  ;;  %p263_p4 = scmp.lt.s32.totalorder %s257_s8, %s257_s8 }
  0x2a   :  { %v51_v16 = vmul.f32 %v43_v13, %v43_v13  ;;  %v52_v17 = vadd.f32 %v49_v9, %v48_v6  ;;  %v71_v20 = vmul.f32 %v47_v8, %v43_v13  ;;  %v69_v23 = vmul.f32 %v45_v1, %v41_v5 }
  0x2b   :  { %63 = vadd.xlane.f32.xlu1 %v62_v14  ;;  %v65_v18 = vadd.f32 %v61_v11, %v60_v10  ;;  %p264_p5 = por %p263_p4, %p262_p3 }
  0x2c   :  { %53 = vadd.xlane.f32.xlu0 %v52_v17  ;;  %v55_v21 = vadd.f32 %v51_v16, %v50_v15  ;;  %v75_v24 = vadd.f32 %v71_v20, %v70_v19  ;;  %v72_v25 = vadd.f32 %v69_v23, %v68_v22 }
  0x2d   :  { %p265_p6 = pnand %p264_p5, %p258_p2 }
  0x2f   :  { %66 = vadd.xlane.f32.xlu1 %v65_v18 }
  0x30   :  { %56 = vadd.xlane.f32.xlu0 %v55_v21 }
  0x33   :  { %76 = vadd.xlane.f32.xlu1 %v75_v24 }
  0x34   :  { %73 = vadd.xlane.f32.xlu0 %v72_v25 }
  0xb8   :  { %v64_v26 = vpop.xlane.xlu1 %63 }
  0xb9   :  { %189 = vrsqrt.f32 %v64_v26  ;;  %v54_v27 = vpop.xlane.xlu0 %53  ;;  %vm96_vm0 = vcmp.eq.f32.partialorder %v64_v26, inf  ;;  %v99_v33 = vand.u32 2147483648, %v64_v26  ;;  %vm98_vm1 = vcmp.eq.f32.partialorder %v64_v26, 0.0 }
  0xba   :  { %191 = vrsqrt.f32 %v54_v27  ;;  %vm80_vm2 = vcmp.eq.f32.partialorder %v54_v27, inf  ;;  %v83_v36 = vand.u32 2147483648, %v54_v27  ;;  %vm82_vm3 = vcmp.eq.f32.partialorder %v54_v27, 0.0 }
  0xbc   :  { %v67_v28 = vpop.xlane.xlu1 %66 }
  0xbd   :  { %193 = vrsqrt.f32 %v67_v28  ;;  %v57_v29 = vpop.xlane.xlu0 %56  ;;  %vm103_vm4 = vcmp.eq.f32.partialorder %v67_v28, inf  ;;  %vm105_vm5 = vcmp.eq.f32.partialorder %v67_v28, 0.0  ;;  %v106_v44 = vand.u32 2147483648, %v67_v28 }
  0xbe   :  { %195 = vrsqrt.f32 %v57_v29  ;;  %vm87_vm6 = vcmp.eq.f32.partialorder %v57_v29, inf  ;;  %vm89_vm7 = vcmp.eq.f32.partialorder %v57_v29, 0.0  ;;  %v90_v48 = vand.u32 2147483648, %v57_v29 }
  0xc0   :  { %v77_v5 = vpop.xlane.xlu1 %76 }
  0xc1   :  { %v74_v61 = vpop.xlane.xlu0 %73 }
  0xc3   :  { %v190_v30 = vpop.eup %189 }
  0xc4   :  { %v192_v31 = vpop.eup %191  ;;  %v95_v32 = vmul.f32 %v190_v30, %v64_v26 }
  0xc5   :  { %v79_v34 = vmul.f32 %v192_v31, %v54_v27 }
  0xc6   :  { %v97_v35 = vsel %vm96_vm0, %v64_v26, %v95_v32 }
  0xc7   :  { %v194_v37 = vpop.eup %193  ;;  %v81_v38 = vsel %vm80_vm2, %v54_v27, %v79_v34  ;;  %v100_v39 = vsel %vm98_vm1, %v99_v33, %v97_v35 }
  0xc8   :  { %v196_v40 = vpop.eup %195  ;;  %v102_v41 = vmul.f32 %v194_v37, %v67_v28  ;;  %v84_v42 = vsel %vm82_vm3, %v83_v36, %v81_v38  ;;  %v108_v43 = vmax.f32 %v100_v39, 1e-12 }
  0xc9   :  { %v86_v45 = vmul.f32 %v196_v40, %v57_v29  ;;  %v92_v46 = vmax.f32 %v84_v42, 1e-12 }
  0xca   :  { %v104_v47 = vsel %vm103_vm4, %v67_v28, %v102_v41  ;;  %v116_v49 = vmul.f32 %v108_v43, %v108_v43 }
  0xcb   :  { %v88_v50 = vsel %vm87_vm6, %v57_v29, %v86_v45  ;;  %v110_v51 = vmul.f32 %v92_v46, %v92_v46  ;;  %v124_v52 = vmul.f32 %v108_v43, %v92_v46  ;;  %v107_v53 = vsel %vm105_vm5, %v106_v44, %v104_v47 }
  0xcc   :  { %197 = vrcp.f32 %v116_v49  ;;  %v109_v54 = vmax.f32 %v107_v53, 1e-12  ;;  %v91_v55 = vsel %vm89_vm7, %v90_v48, %v88_v50 }
  0xcd   :  { %199 = vrcp.f32 %v110_v51  ;;  %v93_v56 = vmax.f32 %v91_v55, 1e-12 }
  0xce   :  { %201 = vrcp.f32 %v124_v52  ;;  %v117_v57 = vmul.f32 %v109_v54, %v109_v54 }
  0xcf   :  { %v111_v58 = vmul.f32 %v93_v56, %v93_v56  ;;  %v125_v59 = vmul.f32 %v109_v54, %v93_v56 }
  0xd0   :  { %203 = vrcp.f32 %v117_v57 }
  0xd1   :  { %205 = vrcp.f32 %v111_v58 }
  0xd2   :  { %207 = vrcp.f32 %v125_v59 }
  0xd6   :  { %v198_v60 = vpop.eup %197 }
  0xd7   :  { %v200_v62 = vpop.eup %199  ;;  %v119_v63 = vmul.f32 %v198_v60, %v64_v26 }
  0xd8   :  { %v202_v0 = vpop.eup %201  ;;  %v113_v1 = vmul.f32 %v200_v62, %v54_v27 }
  0xd9   :  { %v127_v2 = vmul.f32 %v202_v0, %v74_v61 }
  0xda   :  { %v204_v3 = vpop.eup %203  ;;  %v122_v4 = vadd.f32 %v119_v63, %v113_v1 }
  0xdb   :  { %v206_v6 = vpop.eup %205  ;;  %v130_v7 = vmul.f32 2.0, %v127_v2  ;;  %v121_v8 = vmul.f32 %v204_v3, %v67_v28 }
  0xdc   :  { %v208_v9 = vpop.eup %207  ;;  %v115_v10 = vmul.f32 %v206_v6, %v57_v29 }
  0xdd   :  { %v132_v11 = vsub.f32 %v122_v4, %v130_v7  ;;  %v129_v12 = vmul.f32 %v208_v9, %v77_v5 }
  0xde   :  { %v123_v13 = vadd.f32 %v121_v8, %v115_v10 }
  0xdf   :  { %v134_v14 = vmax.f32 %v132_v11, 0.0  ;;  %v131_v15 = vmul.f32 2.0, %v129_v12 }
  0xe1   :  { %v133_v16 = vsub.f32 %v123_v13, %v131_v15  ;;  %209 = vrsqrt.f32 %v134_v14  ;;  %vm138_vm8 = vcmp.eq.f32.partialorder %v134_v14, inf  ;;  %v141_v22 = vand.u32 2147483648, %v134_v14 }
  0xe2   :  { %vm140_vm9 = vcmp.eq.f32.partialorder %v134_v14, 0.0 }
  0xe3   :  { %v135_v17 = vmax.f32 %v133_v16, 0.0 }
  0xe5   :  { %211 = vrsqrt.f32 %v135_v17  ;;  %vm145_vm10 = vcmp.eq.f32.partialorder %v135_v17, inf  ;;  %v148_v25 = vand.u32 2147483648, %v135_v17  ;;  %vm147_vm12 = vcmp.eq.f32.partialorder %v135_v17, 0.0 }
  0xeb   :  { %v210_v18 = vpop.eup %209 }
  0xec   :  { %v137_v19 = vmul.f32 %v210_v18, %v134_v14 }
  0xee   :  { %v139_v20 = vsel %vm138_vm8, %v134_v14, %v137_v19 }
  0xef   :  { %v212_v21 = vpop.eup %211  ;;  %v142_v24 = vsel %vm140_vm9, %v141_v22, %v139_v20 }
  0xf0   :  { %v144_v23 = vmul.f32 %v212_v21, %v135_v17  ;;  %v151_v28 = vsel %vm150_vm11, %v142_v24, 0.0 }
  0xf2   :  { %v146_v26 = vsel %vm145_vm10, %v135_v17, %v144_v23 }
  0xf3   :  { %v149_v27 = vsel %vm147_vm12, %v148_v25, %v146_v26 }
  0xf4   :  { %v152_v29 = vsel %vm150_vm11, %v149_v27, 0.0 }
  0xf5   :  { %v153_v30 = vadd.f32 %v152_v29, %v151_v28 }
  0xf7   :  { %154 = vadd.xlane.f32.xlu0 %v153_v30 }
 0x184   :  { %v155_v31 = vpop.xlane.xlu0 %154 }
 0x185   :  { %v156_v32 = vrot.slane %v155_v31, 4 }
 0x187   :  { %v157_v33 = vadd.f32 %v156_v32, %v155_v31 }
 0x189   :  { %v158_v34 = vrot.slane %v157_v33, 2 }
 0x18b   :  { %v159_v35 = vadd.f32 %v158_v34, %v157_v33 }
 0x18d   :  { %v160_v36 = vrot.slane %v159_v35, 1 }
 0x18f   :  { %v161_v37 = vadd.f32 %v160_v36, %v159_v35 }
 0x191   :  { %182 = vpush %v161_v37 }
 0x1c2   :  { %s183_s7 = spop %182 }
 0x1c3   :  { %v163_v38 = vstv %s183_s7 }
 0x1c4   :  { %v164_v39 = vmul.f32 0.125, %v163_v38 }
 0x1c6   :  { %165 = vst [vmem:[#allocation7] sm:$0xff] %v164_v39 }
 0x1c7   :  { %268 = shalt.err (!%p265_p6)
}
 0x1c8   :  { %s269_s11 = scalar_lea.hbm %s343_s2, 128 }
 0x1c9   :  { %p270_p7 = scmp.ne.s32.totalorder %s343_s2, %s269_s11  ;;  %p273_p8 = scmp.lt.u32.totalorder %s269_s11, %s343_s2 }
 0x1cb   :  { %p275_p9 = pnand %p273_p8, %p270_p7 }
 0x1cd   :  { %278 = shalt.err (!%p275_p9)
}
 0x1ce   :  { %175 = dma.vmem_to_hbm [thread:$0]  %s173_s6, 128, %s343_s2, [#allocation4]  }
 0x1cf   :  { %283 = dma.done.wait [#allocation4], 128  }
 0x1d0   :  { %284 = vsyncadd [#allocation4], 4294967168 }
 0x1d1   :  { %179 = vsyncpa [#allocation3], 1 }
 0x1d2   :  { %180 = vsyncpa [#allocation6], 1 }
 0x1d3   :  { %181 = vsyncpa [#allocation4], 1 }

</bundles_post_ra>
